<compile_context>
chip_gen: v6e
topology: v6e:2x2x1
jax: 0.10.0
libtpu: 0.0.40
codegen_flags: <defaults>
</compile_context>

<pallas_src>
import jax
import jax.numpy as jnp
from jax.experimental import pallas as pl
from jax.experimental.pallas import tpu as pltpu


# ----------------------------------------------------------------------------
# Pallas kernel: ReLU(Tanh(W2 @ ELU(W1 @ x)))   -- everything in VMEM, one shot.
# ----------------------------------------------------------------------------
def adj_update_kernel(x_ref, w1_ref, w2_ref, out_ref):
    x = x_ref[...]                                   # [inc, B]   bf16
    w1 = w1_ref[...]                                 # [hid, inc] bf16
    w2 = w2_ref[...]                                 # [inc, hid] bf16

    # Linear1 (bias-free) in transposed-free form: W1 @ x  -> f32 accumulate on MXU
    z = jnp.dot(w1, x, preferred_element_type=jnp.float32)        # [hid, B] f32
    # ELU (alpha=1), element-wise in f32 (EUP exp; VPU select)
    h = jnp.where(z > 0.0, z, jnp.exp(z) - 1.0)

    # Linear2 (bias-free): W2 @ h  -> bf16 MXU operands, f32 accumulate
    g = jnp.dot(w2, h.astype(w2.dtype), preferred_element_type=jnp.float32)  # [inc, B]

    # Tanh -> ReLU, f32
    out_ref[...] = jnp.maximum(jnp.tanh(g), 0.0)


# ----------------------------------------------------------------------------
# Wrapper: single jit, bf16 casts for MXU operands, whole-array VMEM blocks.
# NOTE: at inc=64 all operands total < 40 KiB; whole-array VMEM residency is safe
# on v5e/v6e (128 MiB) and v7x (64 MiB).  Re-tile with a grid before scaling inc.
# ----------------------------------------------------------------------------
@jax.jit
def adj_update_forward(x, w1, w2):
    xb = x.astype(jnp.bfloat16)
    w1b = w1.astype(jnp.bfloat16)
    w2b = w2.astype(jnp.bfloat16)
    vmem = pl.BlockSpec(memory_space=pltpu.MemorySpace.VMEM)
    return pl.pallas_call(
        adj_update_kernel,
        out_shape=jax.ShapeDtypeStruct(x.shape, jnp.float32),
        in_specs=[vmem, vmem, vmem],
        out_specs=vmem,
    )(xb, w1b, w2b)


# ----------------------------------------------------------------------------
# Pure-JAX reference (literal transcription of the PyTorch forward, f32)
# ----------------------------------------------------------------------------
def adj_update_reference(x, w1, w2):
    xt = x.T                                          # x.transpose(0, 1)
    h = xt @ w1.T                                     # Linear(inc, inc//r, bias=False)
    h = jnp.where(h > 0.0, h, jnp.exp(h) - 1.0)       # ELU
    y = h @ w2.T                                      # Linear(inc//r, inc, bias=False)
    y = jnp.maximum(jnp.tanh(y), 0.0)                 # Tanh -> ReLU
    return y.T                                        # transpose back


if __name__ == "__main__":
    key = jax.random.PRNGKey(0)

    INC = 64              # `inc` (e.g. number of EEG channels)
    REDUCTION = 4         # `reduction_ratio`
    HID = INC // REDUCTION
    B = 64                # second dim of x (adjacency-like square input in GMAE-EEG)

    kx, k1, k2 = jax.random.split(key, 3)
    x = jax.random.normal(kx, (INC, B), dtype=jnp.float32)

    # torch.nn.Linear default init (kaiming_uniform a=sqrt(5) -> U(-1/sqrt(fan_in), ...))
    def linear_init(k, shape):
        bound = 1.0 / jnp.sqrt(jnp.float32(shape[1]))
        return jax.random.uniform(k, shape, jnp.float32, -bound, bound)

    w1 = linear_init(k1, (HID, INC))   # Linear(inc, inc//r).weight  [out, in]
    w2 = linear_init(k2, (INC, HID))   # Linear(inc//r, inc).weight  [out, in]

    out = adj_update_forward(x, w1, w2)
    out = jax.block_until_ready(out)

    ref = adj_update_reference(x, w1, w2)
    assert out.shape == x.shape, f"bad output shape {out.shape}"
    # bf16 MXU operands with f32 accumulation -> loosened tolerance (per review).
    assert jnp.allclose(out, ref, atol=5e-2, rtol=5e-2), \
        "Pallas kernel mismatch vs JAX reference"

    print("KERNEL_OK")
</pallas_src>

<mosaic_0001>
module attributes {stable_mosaic.version = 11 : i64} {
  func.func @adj_update_kernel(%arg0: memref<64x64xbf16, #tpu.memory_space<vmem>>, %arg1: memref<16x64xbf16, #tpu.memory_space<vmem>>, %arg2: memref<64x16xbf16, #tpu.memory_space<vmem>>, %arg3: memref<64x64xf32, #tpu.memory_space<vmem>>) attributes {dimension_semantics = [], scalar_prefetch = 0 : i64, scratch_operands = 0 : i64, tpu.core_type = #tpu.core_type<tc>} {
    %c0 = arith.constant 0 : index
    %c0_0 = arith.constant 0 : index
    %0 = vector.load %arg0[%c0, %c0_0] : memref<64x64xbf16, #tpu.memory_space<vmem>>, vector<64x64xbf16>
    %c0_1 = arith.constant 0 : index
    %c0_2 = arith.constant 0 : index
    %1 = vector.load %arg1[%c0_1, %c0_2] : memref<16x64xbf16, #tpu.memory_space<vmem>>, vector<16x64xbf16>
    %c0_3 = arith.constant 0 : index
    %c0_4 = arith.constant 0 : index
    %2 = vector.load %arg2[%c0_3, %c0_4] : memref<64x16xbf16, #tpu.memory_space<vmem>>, vector<64x16xbf16>
    %cst = arith.constant dense<0.000000e+00> : vector<16x64xf32>
    %3 = tpu.matmul %1, %0, %cst {dimension_numbers = #tpu.dot_dimension_numbers<[1], [0], [0], [1], [0, 0, 1, 1], [], []>} : vector<16x64xbf16>, vector<64x64xbf16>, vector<16x64xf32> -> vector<16x64xf32>
    %cst_5 = arith.constant 0.000000e+00 : f32
    %4 = vector.broadcast %cst_5 : f32 to vector<16x64xf32>
    %5 = arith.cmpf ogt, %3, %4 : vector<16x64xf32>
    %6 = math.exp %3 : vector<16x64xf32>
    %cst_6 = arith.constant 1.000000e+00 : f32
    %7 = vector.broadcast %cst_6 : f32 to vector<16x64xf32>
    %8 = arith.subf %6, %7 : vector<16x64xf32>
    %9 = arith.select %5, %3, %8 : vector<16x64xi1>, vector<16x64xf32>
    %10 = arith.truncf %9 : vector<16x64xf32> to vector<16x64xbf16>
    %cst_7 = arith.constant dense<0.000000e+00> : vector<64x64xf32>
    %11 = tpu.matmul %2, %10, %cst_7 {dimension_numbers = #tpu.dot_dimension_numbers<[1], [0], [0], [1], [0, 0, 1, 1], [], []>} : vector<64x16xbf16>, vector<16x64xbf16>, vector<64x64xf32> -> vector<64x64xf32>
    %12 = math.tanh %11 : vector<64x64xf32>
    %cst_8 = arith.constant 0.000000e+00 : f32
    %13 = vector.broadcast %cst_8 : f32 to vector<64x64xf32>
    %14 = arith.maximumf %12, %13 : vector<64x64xf32>
    %c0_9 = arith.constant 0 : index
    %c0_10 = arith.constant 0 : index
    %15 = vector.load %arg3[%c0_9, %c0_10] : memref<64x64xf32, #tpu.memory_space<vmem>>, vector<64x64xf32>
    tpu.vector_store %arg3[%c0_9, %c0_10], %14 {strides = array<i32>} : memref<64x64xf32, #tpu.memory_space<vmem>>, vector<64x64xf32>,
    return
  }
}

</mosaic_0001>

<bundles_post_ra>
// kernel: adj_update_forward.1
= control target key start
LH: loop header
LB: loop body
LE: loop exit
PB: predicated region body
PF: predicated region fallthrough
CT: control target
= control target key end

     0   :  { %v361_v1 = vmov 0.0   ;;  %vm362_vm0 = vmmov 0   ;;  %s429_s0 = inlined_call_operand.vmem [shape: bf16[64,64], index: 0, kind: input, shape index: {}]   ;;  %s430_s1 = inlined_call_operand.vmem [shape: bf16[16,64], index: 1, kind: input, shape index: {}]   ;;  %s431_s2 = inlined_call_operand.vmem [shape: bf16[64,16], index: 2, kind: input, shape index: {}]   ;;  %s432_s3 = inlined_call_operand.hbm [shape: f32[64,64], index: 3, kind: output, shape index: {}]  }
   0x1   :  { %v310_v0 = vld [vmem:[%s429_s0 + $0x18] sm:$0xff]   ;;  %283 = vmatprep.subr.bf16.mxu0 %v361_v1  ;;  %v311_v2 = vld [vmem:[%s429_s0 + $0x10] sm:$0xff]   ;;  %291 = vmatprep.mubr.msk.bf16.mxu0 %vm362_vm0, %v361_v1  ;;  %v312_v3 = vld [vmem:[%s429_s0 + $0x8] sm:$0xff]  }
   0x2   :  { %284 = vmatpush3.bf16.msra.mxu0 %v310_v0 }
   0x3   :  { %285 = vmatprep.subr.bf16.mxu0 %v361_v1 }
   0x6   :  { %286 = vmatpush3.bf16.msra.mxu0 %v311_v2 }
   0x7   :  { %287 = vmatprep.subr.bf16.mxu0 %v361_v1 }
   0x8   :  { %8 = vsyncpa [#allocation3], 0  ;;  %v313_v4 = vld [vmem:[%s429_s0] sm:$0xff]   ;;  %vm63_vm1 = vcmask 523264   ;;  %vm139_vm2 = vcmask 130048   ;;  %v316_v20 = vld [vmem:[%s431_s2 + $0x8] sm:$0xff]  }
   0x9   :  { %v314_v5 = vld [vmem:[%s430_s1] sm:$0xff]   ;;  %v317_v21 = vld [vmem:[%s431_s2 + $0x10] sm:$0xff]   ;;  %v318_v22 = vld [vmem:[%s431_s2 + $0x18] sm:$0xff]  }
   0xa   :  { %288 = vmatpush3.bf16.msra.mxu0 %v312_v3  ;;  %v315_v6 = vld [vmem:[%s431_s2] sm:$0xff]   ;;  %s363_s2 = smov [#allocation2]  }
   0xb   :  { %289 = vmatprep.subr.bf16.mxu0 %v361_v1  ;;  %297 = vmatprep.mubr.msk.bf16.mxu1 %vm139_vm2, %v315_v6  ;;  %s246_s28 = sshll.u32 %s363_s2, 4  ;;  %s247_s28 = int_to_ptr.vmem [resolvable:$true] %s246_s28 }
   0xc   :  { %s339_s29 = scalar_lea.vmem %s247_s28, 1024  ;;  %p344_p1 = scmp.lt.s32.totalorder %s247_s28, %s247_s28 }
   0xd   :  { %p340_p0 = scmp.ne.s32.totalorder %s247_s28, %s339_s29  ;;  %p345_p2 = scmp.lt.s32.totalorder %s339_s29, %s339_s29 }
   0xe   :  { %290 = vmatpush3.bf16.msra.mxu0 %v313_v4 }
   0xf   :  { %p346_p3 = por %p345_p2, %p344_p1 }
  0x11   :  { %292 = vmatmul.mubr.msk.bf16.vlgmr.msra.gmra.mxu0 %vm63_vm1, %v314_v5  ;;  %p347_p4 = pnand %p346_p3, %p340_p0 }
  0xd1   :  { %v101_v7 = vpop.f32.mrf.mxu0 }
  0xd2   :  { %v110_v8 = vmul.f32 1.442695, %v101_v7  ;;  %vm108_vm3 = vcmp.gt.f32.partialorder %v101_v7, 0.0 }
  0xd3   :  { %v293_v9 = vpop.f32.mrf.mxu0 }
  0xd4   :  { %319 = vpow2.f32 %v110_v8 }
  0xd5   :  { %v104_v10 = vpop.f32.mrf.mxu0 }
  0xd6   :  { %v112_v11 = vmul.f32 1.442695, %v104_v10  ;;  %vm109_vm4 = vcmp.gt.f32.partialorder %v104_v10, 0.0 }
  0xd7   :  { %v294_v12 = vpop.f32.mrf.mxu0 }
  0xd8   :  { %321 = vpow2.f32 %v112_v11 }
  0xe1   :  { %v320_v13 = vpop.eup %319 }
  0xe2   :  { %v263_v14 = vadd.f32 -1.0, %v320_v13 }
  0xe4   :  { %v116_v17 = vsel %vm108_vm3, %v101_v7, %v263_v14 }
  0xe5   :  { %v322_v15 = vpop.eup %321 }
  0xe6   :  { %v264_v16 = vadd.f32 -1.0, %v322_v15 }
  0xe8   :  { %v117_v18 = vsel %vm109_vm4, %v104_v10, %v264_v16 }
  0xe9   :  { %v118_v19 = vpack.c.bf16 %v117_v18, %v116_v17 }
  0xeb   :  { %295 = vmatprep.subr.bf16.mxu1 %v118_v19 }
  0xec   :  { %296 = vmatpush3.bf16.msra.mxu1 %v118_v19 }
  0xef   :  { %298 = vmatmul.mubr.msk.bf16.vlgmr.msra.gmra.mxu1 %vm139_vm2, %v316_v20 }
  0xf0   :  { %301 = vmatprep.mubr.msk.bf16.mxu1 %vm139_vm2, %v317_v21 }
  0xf7   :  { %302 = vmatmul.mubr.msk.bf16.gmra.mxu1 %vm139_vm2, %v318_v22 }
 0x1af   :  { %v299_v23 = vpop.f32.mrf.mxu1 }
 0x1b0   :  { %323 = vtanh.f32 %v299_v23 }
 0x1b1   :  { %v186_v24 = vpop.f32.mrf.mxu1 }
 0x1b2   :  { %325 = vtanh.f32 %v186_v24 }
 0x1b3   :  { %v300_v25 = vpop.f32.mrf.mxu1 }
 0x1b4   :  { %327 = vtanh.f32 %v300_v25 }
 0x1b5   :  { %v189_v26 = vpop.f32.mrf.mxu1 }
 0x1b6   :  { %329 = vtanh.f32 %v189_v26 }
 0x1b7   :  { %v303_v27 = vpop.f32.mrf.mxu1 }
 0x1b8   :  { %331 = vtanh.f32 %v303_v27 }
 0x1b9   :  { %v202_v28 = vpop.f32.mrf.mxu1 }
 0x1ba   :  { %333 = vtanh.f32 %v202_v28 }
 0x1bb   :  { %v304_v29 = vpop.f32.mrf.mxu1 }
 0x1bc   :  { %335 = vtanh.f32 %v304_v29 }
 0x1bd   :  { %v324_v30 = vpop.eup %323  ;;  %v205_v31 = vpop.f32.mrf.mxu1 }
 0x1be   :  { %v227_v32 = vmax.f32 %v324_v30, 0.0  ;;  %337 = vtanh.f32 %v205_v31 }
 0x1bf   :  { %v326_v33 = vpop.eup %325 }
 0x1c0   :  { %235 = vst.msk [vmem:[#allocation2 + $0x10] sm:$0xff] %vm63_vm1, %v227_v32  ;;  %v225_v34 = vmax.f32 %v326_v33, 0.0 }
 0x1c1   :  { %v328_v35 = vpop.eup %327 }
 0x1c2   :  { %233 = vst.msk [vmem:[#allocation2] sm:$0xff] %vm63_vm1, %v225_v34  ;;  %v228_v36 = vmax.f32 %v328_v35, 0.0 }
 0x1c3   :  { %v330_v37 = vpop.eup %329 }
 0x1c4   :  { %236 = vst.msk [vmem:[#allocation2 + $0x18] sm:$0xff] %vm63_vm1, %v228_v36  ;;  %v226_v38 = vmax.f32 %v330_v37, 0.0 }
 0x1c5   :  { %v332_v39 = vpop.eup %331 }
 0x1c6   :  { %234 = vst.msk [vmem:[#allocation2 + $0x8] sm:$0xff] %vm63_vm1, %v226_v38  ;;  %v231_v40 = vmax.f32 %v332_v39, 0.0 }
 0x1c7   :  { %v334_v41 = vpop.eup %333 }
 0x1c8   :  { %239 = vst.msk [vmem:[#allocation2 + $0x30] sm:$0xff] %vm63_vm1, %v231_v40  ;;  %v229_v42 = vmax.f32 %v334_v41, 0.0 }
 0x1c9   :  { %v336_v43 = vpop.eup %335 }
 0x1ca   :  { %237 = vst.msk [vmem:[#allocation2 + $0x20] sm:$0xff] %vm63_vm1, %v229_v42  ;;  %v232_v44 = vmax.f32 %v336_v43, 0.0 }
 0x1cb   :  { %v338_v45 = vpop.eup %337 }
 0x1cc   :  { %240 = vst.msk [vmem:[#allocation2 + $0x38] sm:$0xff] %vm63_vm1, %v232_v44  ;;  %v230_v46 = vmax.f32 %v338_v45, 0.0 }
 0x1ce   :  { %238 = vst.msk [vmem:[#allocation2 + $0x28] sm:$0xff] %vm63_vm1, %v230_v46 }
 0x1cf   :  { %350 = shalt.err (!%p347_p4)
}
 0x1d0   :  { %s364_s30 = smov 128   ;;  %s365_s4 = smov 8  }
 0x1d1   :  { %252 = dma.vmem_to_hbm [thread:$0]  %s247_s28, 1024, %s432_s3, [#allocation3], %s364_s30, %s364_s30, %s365_s4  }
 0x1d2   :  { %359 = dma.done.wait [#allocation3], 1024  }
 0x1d3   :  { %360 = vsyncadd [#allocation3], 4294966272 }
 0x1d4   :  { %256 = vsyncpa [#allocation3], 1 }

</bundles_post_ra>
